<compile_context>
chip_gen: v7x
topology: tpu7x:2x2x1
jax: 0.10.0
libtpu: 0.0.40
codegen_flags: <defaults>
</compile_context>

<pallas_src>
import jax
import jax.numpy as jnp
from jax import lax
from jax.experimental import pallas as pl
from jax.experimental.pallas import tpu as pltpu


_VMEM = pl.BlockSpec(memory_space=pltpu.MemorySpace.VMEM)
_SMEM = pl.BlockSpec(memory_space=pltpu.MemorySpace.SMEM)
_SUBLANE = 8
_LANE = 128


def _round_up(x, m):
    return ((x + m - 1) // m) * m


# ---------------------------------------------------------------------------
# Fused Seq2Seq forward kernel (single grid point, everything VMEM-resident)
# ---------------------------------------------------------------------------
def _make_seq2seq_kernel(n_layers, hid_dim, src_len, max_len, b_pad):
    H = hid_dim
    G = 4 * H

    def kernel(*refs):
        # Argument layout (built by the wrapper):
        #   [0]               tf_mask   (max_len,) int32                SMEM
        #   [1]               src_flat  (src_len*b_pad, in_dim)  f32
        #   [2]               trg_flat  (max_len*b_pad, out_dim) f32
        #   [3 .. 3+3L)       encoder layers: (w_ih_t, w_hh_t, b) * L
        #   [3+3L .. 3+6L)    decoder layers: (w_ih_t, w_hh_t, b) * L
        #   [..+0..3]         fc_w (H,out_pad) bf16, fc_b (1,out_pad) f32,
        #                     fb_w (H,4H) bf16 (= fc_w @ W_ih_dec0),
        #                     fb_b (1,4H) f32  (= fc_b @ W_ih_dec0)
        #   [..+4]            out_flat  (max_len*b_pad, out_pad) f32   (output)
        #   [..+5..8]         scratch: src_proj, trg_proj, hid, x0p
        tf_ref, src_ref, trg_ref = refs[0], refs[1], refs[2]
        base = 3
        enc = refs[base: base + 3 * n_layers]
        dec = refs[base + 3 * n_layers: base + 6 * n_layers]
        idx = base + 6 * n_layers
        fc_w_ref, fc_b_ref, fb_w_ref, fb_b_ref = refs[idx: idx + 4]
        out_ref = refs[idx + 4]
        src_proj_ref, trg_proj_ref, hid_ref, x0p_ref = refs[idx + 5: idx + 9]

        # Hoisted lane mask: tanh on the g-gate lanes [2H, 3H); the three
        # sigmoid gates reuse the SAME tanh pass via
        # sigmoid(x) = 0.5 * tanh(0.5 * x) + 0.5  -> one EUP pass per cell.
        lane = lax.broadcasted_iota(jnp.int32, (b_pad, G), 1)
        g_mask = (lane >= 2 * H) & (lane < 3 * H)

        def gate_act(gates):
            pre = jnp.where(g_mask, gates, 0.5 * gates)
            th = jnp.tanh(pre)
            return jnp.where(g_mask, th, 0.5 * th + 0.5)

        def bf16(x):
            return x.astype(jnp.bfloat16)

        def cell_from_proj(x_proj, h, c, w_hh_ref, b_ref):
            # x_proj already holds x @ W_ih (f32 accumulator).
            gates = (x_proj
                     + jnp.dot(bf16(h), w_hh_ref[...],
                               preferred_element_type=jnp.float32)
                     + b_ref[...])
            act = gate_act(gates)
            i_g = act[:, 0 * H:1 * H]
            f_g = act[:, 1 * H:2 * H]
            g_g = act[:, 2 * H:3 * H]
            o_g = act[:, 3 * H:4 * H]
            c_new = f_g * c + i_g * g_g
            h_new = o_g * jnp.tanh(c_new)
            return h_new, c_new

        def cell(x, h, c, w_ih_ref, w_hh_ref, b_ref):
            x_proj = jnp.dot(bf16(x), w_ih_ref[...],
                             preferred_element_type=jnp.float32)
            return cell_from_proj(x_proj, h, c, w_hh_ref, b_ref)

        def row_slice(t):
            start = t * b_pad
            if not isinstance(start, int):
                start = pl.multiple_of(start, b_pad)
            return pl.ds(start, b_pad)

        # -- Non-recurrent layer-0 input projections, batched over all steps
        #    (one well-shaped MXU matmul each instead of T tiny M=8 matmuls
        #     sitting on the serial recurrence).
        src_proj_ref[...] = jnp.dot(bf16(src_ref[...]), enc[0][...],
                                    preferred_element_type=jnp.float32)
        trg_proj_ref[...] = jnp.dot(bf16(trg_ref[...]), dec[0][...],
                                    preferred_element_type=jnp.float32)

        zero = jnp.zeros((b_pad, H), jnp.float32)
        init_state = (tuple(zero for _ in range(n_layers)),
                      tuple(zero for _ in range(n_layers)))

        # ----------------------------- encoder ------------------------------
        # NOTE: fusing [W_ih; W_hh] into one matmul for layers l>0 was
        # considered (review item) but needs an in-kernel lane concat; skipped
        # for lowering robustness at these tiny shapes.
        def enc_body(t, carry):
            h, c = carry
            h, c = list(h), list(c)
            x0p = src_proj_ref[row_slice(t), :]
            h[0], c[0] = cell_from_proj(x0p, h[0], c[0], enc[1], enc[2])
            x = h[0]
            for l in range(1, n_layers):
                h[l], c[l] = cell(x, h[l], c[l],
                                  enc[3 * l], enc[3 * l + 1], enc[3 * l + 2])
                x = h[l]
            return tuple(h), tuple(c)

        state = lax.fori_loop(0, src_len, enc_body, init_state)

        # ----------------------------- decoder ------------------------------
        x0p_ref[...] = trg_proj_ref[row_slice(0), :]   # input_0 = trg[0]

        def dec_body(t, carry):
            h, c = carry
            h, c = list(h), list(c)
            x0p = x0p_ref[...]
            h[0], c[0] = cell_from_proj(x0p, h[0], c[0], dec[1], dec[2])
            x = h[0]
            for l in range(1, n_layers):
                h[l], c[l] = cell(x, h[l], c[l],
                                  dec[3 * l], dec[3 * l + 1], dec[3 * l + 2])
                x = h[l]
            # Store top-layer hidden; FC projection of the OUTPUTS is deferred
            # to one batched matmul after the loop.
            hid_ref[row_slice(t), :] = x

            # Next step's layer-0 input projection:
            #   teacher forced -> precomputed trg[t+1] @ W_ih_dec0 (a load)
            #   not forced     -> h_top @ (fc_w @ W_ih_dec0) + fc_b @ W_ih_dec0
            # Only one of the two writes executes per step.
            t_next = jnp.minimum(t + 1, max_len - 1)
            need_fb = jnp.logical_and(tf_ref[t] == 0, t + 1 < max_len)

            @pl.when(need_fb)
            def _():
                x0p_ref[...] = (jnp.dot(bf16(x), fb_w_ref[...],
                                        preferred_element_type=jnp.float32)
                                + fb_b_ref[...])

            @pl.when(jnp.logical_not(need_fb))
            def _():
                x0p_ref[...] = trg_proj_ref[row_slice(t_next), :]

            return tuple(h), tuple(c)

        lax.fori_loop(0, max_len, dec_body, state)

        # ---- deferred output projection: one (max_len*b_pad, H) @ (H, 128)
        # matmul and a single lane-dense store.
        out_ref[...] = (jnp.dot(bf16(hid_ref[...]), fc_w_ref[...],
                                preferred_element_type=jnp.float32)
                        + fc_b_ref[...])

    return kernel


# ---------------------------------------------------------------------------
# Wrapper: padding, weight prep / fusion, pallas_call
# ---------------------------------------------------------------------------
def seq2seq_forward(params, src, trg, tf_mask):
    """src: (src_len, B, in_dim); trg: (max_len, B, out_dim);
    tf_mask: (max_len,) teacher-forcing decisions.  -> (max_len, B, out_dim)."""
    src_len, batch, in_dim = src.shape
    max_len, _, out_dim = trg.shape
    n_layers = len(params["enc"])
    hid_dim = params["enc"][0]["w_hh_t"].shape[0]

    b_pad = _round_up(batch, _SUBLANE)
    out_pad = _round_up(out_dim, _LANE)

    # Batch padded to full sublanes; sequences flattened to 2-D so a step is a
    # contiguous pl.ds(t*b_pad, b_pad) row slab (no in-kernel reshape needed).
    src_flat = jnp.pad(src, ((0, 0), (0, b_pad - batch), (0, 0))
                       ).reshape(src_len * b_pad, in_dim)
    trg_flat = jnp.pad(trg, ((0, 0), (0, b_pad - batch), (0, 0))
                       ).reshape(max_len * b_pad, out_dim)

    # FC head padded to 128 output lanes -> the deferred output matmul stores
    # lane-dense tiles; wrapper slices the real out_dim back out.
    fc_w = params["fc"]["w_t"]                       # (H, out_dim)
    fc_b = params["fc"]["b"]                         # (1, out_dim)
    fc_w_p = jnp.pad(fc_w, ((0, 0), (0, out_pad - out_dim))).astype(jnp.bfloat16)
    fc_b_p = jnp.pad(fc_b, ((0, 0), (0, out_pad - out_dim)))

    # Fused feedback weights: (h_top @ fc_w + fc_b) @ W_ih_dec0
    #   = h_top @ (fc_w @ W_ih_dec0) + (fc_b @ W_ih_dec0)
    # so the non-teacher-forced feedback is ONE small matmul and the full FC
    # projection never sits on the recurrent chain.
    w_ih_dec0 = params["dec"][0]["w_ih_t"]           # (out_dim, 4H)
    fb_w = jnp.dot(fc_w, w_ih_dec0).astype(jnp.bfloat16)   # (H, 4H)
    fb_b = jnp.dot(fc_b, w_ih_dec0)                         # (1, 4H) f32

    flat_w = []
    for p in params["enc"] + params["dec"]:
        flat_w += [p["w_ih_t"].astype(jnp.bfloat16),
                   p["w_hh_t"].astype(jnp.bfloat16),
                   p["b"]]

    kernel = _make_seq2seq_kernel(n_layers, hid_dim, src_len, max_len, b_pad)
    n_vmem_in = 2 + 6 * n_layers + 4

    # Everything is VMEM-resident (<1 MiB at these sizes).  For large
    # src_len / max_len / batch (especially on v7x's 64 MiB VMEM) add a batch
    # grid axis with dimension_semantics=("parallel",) and tile the sequences.
    out_flat = pl.pallas_call(
        kernel,
        out_shape=jax.ShapeDtypeStruct((max_len * b_pad, out_pad), jnp.float32),
        in_specs=[_SMEM] + [_VMEM] * n_vmem_in,
        out_specs=_VMEM,
        scratch_shapes=[
            pltpu.VMEM((src_len * b_pad, 4 * hid_dim), jnp.float32),  # src_proj
            pltpu.VMEM((max_len * b_pad, 4 * hid_dim), jnp.float32),  # trg_proj
            pltpu.VMEM((max_len * b_pad, hid_dim), jnp.float32),      # top hidden
            pltpu.VMEM((b_pad, 4 * hid_dim), jnp.float32),            # next x0 proj
        ],
    )(tf_mask.astype(jnp.int32), src_flat, trg_flat, *flat_w,
      fc_w_p, fc_b_p, fb_w, fb_b)

    out = out_flat.reshape(max_len, b_pad, out_pad)
    return out[:, :batch, :out_dim]


# ---------------------------------------------------------------------------
# Pure-JAX f32 reference (same semantics as the PyTorch module)
# ---------------------------------------------------------------------------
def seq2seq_reference(params, src, trg, tf_mask):
    n_layers = len(params["enc"])
    H = params["enc"][0]["w_hh_t"].shape[0]
    B = src.shape[1]

    def lstm_cell(p, x, h, c):
        g = x @ p["w_ih_t"] + h @ p["w_hh_t"] + p["b"]
        i = jax.nn.sigmoid(g[:, :H])
        f = jax.nn.sigmoid(g[:, H:2 * H])
        gg = jnp.tanh(g[:, 2 * H:3 * H])
        o = jax.nn.sigmoid(g[:, 3 * H:])
        c = f * c + i * gg
        return o * jnp.tanh(c), c

    h = [jnp.zeros((B, H), jnp.float32) for _ in range(n_layers)]
    c = [jnp.zeros((B, H), jnp.float32) for _ in range(n_layers)]
    for t in range(src.shape[0]):
        x = src[t]
        for l in range(n_layers):
            h[l], c[l] = lstm_cell(params["enc"][l], x, h[l], c[l])
            x = h[l]

    outs = []
    inp = trg[0]
    for t in range(trg.shape[0]):
        x = inp
        for l in range(n_layers):
            h[l], c[l] = lstm_cell(params["dec"][l], x, h[l], c[l])
            x = h[l]
        out = x @ params["fc"]["w_t"] + params["fc"]["b"]
        outs.append(out)
        if t < trg.shape[0] - 1:
            inp = jnp.where(tf_mask[t] != 0, trg[t + 1], out)
    return jnp.stack(outs)


# ---------------------------------------------------------------------------
# Parameter construction (deterministic, in-script)
# ---------------------------------------------------------------------------
def make_lstm_layer_params(key, in_dim, hid_dim):
    k1, k2, k3 = jax.random.split(key, 3)
    scale = 0.1
    return {
        "w_ih_t": scale * jax.random.normal(k1, (in_dim, 4 * hid_dim), jnp.float32),
        "w_hh_t": scale * jax.random.normal(k2, (hid_dim, 4 * hid_dim), jnp.float32),
        # Single combined bias (= b_ih + b_hh when importing PyTorch weights).
        "b": scale * jax.random.normal(k3, (1, 4 * hid_dim), jnp.float32),
    }


def make_params(key, input_dim, output_dim, hid_dim, n_layers):
    keys = jax.random.split(key, 2 * n_layers + 1)
    enc_layers = [
        make_lstm_layer_params(keys[l], input_dim if l == 0 else hid_dim, hid_dim)
        for l in range(n_layers)
    ]
    dec_layers = [
        make_lstm_layer_params(keys[n_layers + l],
                               output_dim if l == 0 else hid_dim, hid_dim)
        for l in range(n_layers)
    ]
    kf1, kf2 = jax.random.split(keys[-1])
    fc = {
        "w_t": 0.1 * jax.random.normal(kf1, (hid_dim, output_dim), jnp.float32),
        "b": 0.1 * jax.random.normal(kf2, (1, output_dim), jnp.float32),
    }
    return {"enc": enc_layers, "dec": dec_layers, "fc": fc}


# ---------------------------------------------------------------------------
# Main
# ---------------------------------------------------------------------------
if __name__ == "__main__":
    INPUT_DIM = 8     # src feature dim
    OUTPUT_DIM = 8    # trg feature dim
    HID_DIM = 32
    N_LAYERS = 2
    SRC_LEN = 6
    MAX_LEN = 8
    BATCH = 2
    TF_RATIO = 0.5

    root = jax.random.PRNGKey(0)
    k_params, k_src, k_trg, k_tf = jax.random.split(root, 4)

    params = make_params(k_params, INPUT_DIM, OUTPUT_DIM, HID_DIM, N_LAYERS)
    src = jax.random.normal(k_src, (SRC_LEN, BATCH, INPUT_DIM), jnp.float32)
    trg = jax.random.normal(k_trg, (MAX_LEN, BATCH, OUTPUT_DIM), jnp.float32)
    # Precomputed teacher-forcing decisions (deterministic surrogate for the
    # reference's per-step Python random.random()).
    tf_mask = (jax.random.uniform(k_tf, (MAX_LEN,)) < TF_RATIO).astype(jnp.int32)

    fwd = jax.jit(seq2seq_forward)
    out = jax.block_until_ready(fwd(params, src, trg, tf_mask))

    assert out.shape == (MAX_LEN, BATCH, OUTPUT_DIM)
    assert bool(jnp.all(jnp.isfinite(out)))

    ref = seq2seq_reference(params, src, trg, tf_mask)
    err = float(jnp.max(jnp.abs(out - ref)))
    assert err < 5e-2, f"mismatch vs reference: max|diff|={err}"

    print("KERNEL_OK")
</pallas_src>

<mosaic_0001>
module attributes {stable_mosaic.version = 11 : i64} {
  func.func @kernel(%arg0: memref<8xi32, #tpu.memory_space<smem>>, %arg1: memref<48x8xf32, #tpu.memory_space<vmem>>, %arg2: memref<64x8xf32, #tpu.memory_space<vmem>>, %arg3: memref<8x128xbf16, #tpu.memory_space<vmem>>, %arg4: memref<32x128xbf16, #tpu.memory_space<vmem>>, %arg5: memref<1x128xf32, #tpu.memory_space<vmem>>, %arg6: memref<32x128xbf16, #tpu.memory_space<vmem>>, %arg7: memref<32x128xbf16, #tpu.memory_space<vmem>>, %arg8: memref<1x128xf32, #tpu.memory_space<vmem>>, %arg9: memref<8x128xbf16, #tpu.memory_space<vmem>>, %arg10: memref<32x128xbf16, #tpu.memory_space<vmem>>, %arg11: memref<1x128xf32, #tpu.memory_space<vmem>>, %arg12: memref<32x128xbf16, #tpu.memory_space<vmem>>, %arg13: memref<32x128xbf16, #tpu.memory_space<vmem>>, %arg14: memref<1x128xf32, #tpu.memory_space<vmem>>, %arg15: memref<32x128xbf16, #tpu.memory_space<vmem>>, %arg16: memref<1x128xf32, #tpu.memory_space<vmem>>, %arg17: memref<32x128xbf16, #tpu.memory_space<vmem>>, %arg18: memref<1x128xf32, #tpu.memory_space<vmem>>, %arg19: memref<64x128xf32, #tpu.memory_space<vmem>>, %arg20: memref<48x128xf32, #tpu.memory_space<vmem>>, %arg21: memref<64x128xf32, #tpu.memory_space<vmem>>, %arg22: memref<64x32xf32, #tpu.memory_space<vmem>>, %arg23: memref<8x128xf32, #tpu.memory_space<vmem>>) attributes {dimension_semantics = [], scalar_prefetch = 0 : i64, scratch_operands = 4 : i64, tpu.core_type = #tpu.core_type<tc>} {
    %0 = tpu.iota {dimensions = array<i32: 1>} : vector<8x128xi32>
    %c64_i32 = arith.constant 64 : i32
    %1 = vector.broadcast %c64_i32 : i32 to vector<8x128xi32>
    %2 = arith.cmpi sge, %0, %1 : vector<8x128xi32>
    %c96_i32 = arith.constant 96 : i32
    %3 = vector.broadcast %c96_i32 : i32 to vector<8x128xi32>
    %4 = arith.cmpi slt, %0, %3 : vector<8x128xi32>
    %5 = arith.andi %2, %4 : vector<8x128xi1>
    %c0 = arith.constant 0 : index
    %c0_0 = arith.constant 0 : index
    %6 = vector.load %arg1[%c0, %c0_0] : memref<48x8xf32, #tpu.memory_space<vmem>>, vector<48x8xf32>
    %7 = arith.truncf %6 : vector<48x8xf32> to vector<48x8xbf16>
    %c0_1 = arith.constant 0 : index
    %c0_2 = arith.constant 0 : index
    %8 = vector.load %arg3[%c0_1, %c0_2] : memref<8x128xbf16, #tpu.memory_space<vmem>>, vector<8x128xbf16>
    %cst = arith.constant dense<0.000000e+00> : vector<48x128xf32>
    %9 = tpu.matmul %7, %8, %cst {dimension_numbers = #tpu.dot_dimension_numbers<[1], [0], [0], [1], [0, 0, 1, 1], [], []>} : vector<48x8xbf16>, vector<8x128xbf16>, vector<48x128xf32> -> vector<48x128xf32>
    %c0_3 = arith.constant 0 : index
    %c0_4 = arith.constant 0 : index
    %10 = vector.load %arg20[%c0_3, %c0_4] : memref<48x128xf32, #tpu.memory_space<vmem>>, vector<48x128xf32>
    tpu.vector_store %arg20[%c0_3, %c0_4], %9 {strides = array<i32>} : memref<48x128xf32, #tpu.memory_space<vmem>>, vector<48x128xf32>,
    %c0_5 = arith.constant 0 : index
    %c0_6 = arith.constant 0 : index
    %11 = vector.load %arg2[%c0_5, %c0_6] : memref<64x8xf32, #tpu.memory_space<vmem>>, vector<64x8xf32>
    %12 = arith.truncf %11 : vector<64x8xf32> to vector<64x8xbf16>
    %c0_7 = arith.constant 0 : index
    %c0_8 = arith.constant 0 : index
    %13 = vector.load %arg9[%c0_7, %c0_8] : memref<8x128xbf16, #tpu.memory_space<vmem>>, vector<8x128xbf16>
    %cst_9 = arith.constant dense<0.000000e+00> : vector<64x128xf32>
    %14 = tpu.matmul %12, %13, %cst_9 {dimension_numbers = #tpu.dot_dimension_numbers<[1], [0], [0], [1], [0, 0, 1, 1], [], []>} : vector<64x8xbf16>, vector<8x128xbf16>, vector<64x128xf32> -> vector<64x128xf32>
    %c0_10 = arith.constant 0 : index
    %c0_11 = arith.constant 0 : index
    %15 = vector.load %arg21[%c0_10, %c0_11] : memref<64x128xf32, #tpu.memory_space<vmem>>, vector<64x128xf32>
    tpu.vector_store %arg21[%c0_10, %c0_11], %14 {strides = array<i32>} : memref<64x128xf32, #tpu.memory_space<vmem>>, vector<64x128xf32>,
    %cst_12 = arith.constant 0.000000e+00 : f32
    %16 = vector.broadcast %cst_12 : f32 to vector<8x32xf32>
    %c0_i32 = arith.constant 0 : i32
    %c6_i32 = arith.constant 6 : i32
    %17 = arith.addi %c0_i32, %c6_i32 : i32
    %c1_i32 = arith.constant 1 : i32
    %18:4 = scf.for %arg24 = %c0_i32 to %17 step %c1_i32 iter_args(%arg25 = %16, %arg26 = %16, %arg27 = %16, %arg28 = %16) -> (vector<8x32xf32>, vector<8x32xf32>, vector<8x32xf32>, vector<8x32xf32>)  : i32 {
      %c8_i32_30 = arith.constant 8 : i32
      %31 = arith.muli %arg24, %c8_i32_30 : i32
      %32 = tpu.assume_multiple %31, 8 : i32
      %33 = arith.index_cast %32 : i32 to index
      %c0_31 = arith.constant 0 : index
      %34 = vector.load %arg20[%33, %c0_31] : memref<48x128xf32, #tpu.memory_space<vmem>>, vector<8x128xf32>
      %35 = arith.truncf %arg25 : vector<8x32xf32> to vector<8x32xbf16>
      %c0_32 = arith.constant 0 : index
      %c0_33 = arith.constant 0 : index
      %36 = vector.load %arg4[%c0_32, %c0_33] : memref<32x128xbf16, #tpu.memory_space<vmem>>, vector<32x128xbf16>
      %cst_34 = arith.constant dense<0.000000e+00> : vector<8x128xf32>
      %37 = tpu.matmul %35, %36, %cst_34 {dimension_numbers = #tpu.dot_dimension_numbers<[1], [0], [0], [1], [0, 0, 1, 1], [], []>} : vector<8x32xbf16>, vector<32x128xbf16>, vector<8x128xf32> -> vector<8x128xf32>
      %38 = arith.addf %34, %37 : vector<8x128xf32>
      %c0_35 = arith.constant 0 : index
      %c0_36 = arith.constant 0 : index
      %39 = vector.load %arg5[%c0_35, %c0_36] : memref<1x128xf32, #tpu.memory_space<vmem>>, vector<1x128xf32>
      %40 = vector.broadcast %39 : vector<1x128xf32> to vector<8x128xf32>
      %41 = arith.addf %38, %40 : vector<8x128xf32>
      %cst_37 = arith.constant 5.000000e-01 : f32
      %42 = vector.broadcast %cst_37 : f32 to vector<8x128xf32>
      %43 = arith.mulf %42, %41 : vector<8x128xf32>
      %44 = arith.select %5, %41, %43 : vector<8x128xi1>, vector<8x128xf32>
      %45 = math.tanh %44 : vector<8x128xf32>
      %cst_38 = arith.constant 5.000000e-01 : f32
      %46 = vector.broadcast %cst_38 : f32 to vector<8x128xf32>
      %47 = arith.mulf %46, %45 : vector<8x128xf32>
      %cst_39 = arith.constant 5.000000e-01 : f32
      %48 = vector.broadcast %cst_39 : f32 to vector<8x128xf32>
      %49 = arith.addf %47, %48 : vector<8x128xf32>
      %50 = arith.select %5, %45, %49 : vector<8x128xi1>, vector<8x128xf32>
      %51 = vector.extract_strided_slice %50 {offsets = [0, 0], sizes = [8, 32], strides = [1, 1]} : vector<8x128xf32> to vector<8x32xf32>
      %52 = vector.extract_strided_slice %50 {offsets = [0, 32], sizes = [8, 32], strides = [1, 1]} : vector<8x128xf32> to vector<8x32xf32>
      %53 = vector.extract_strided_slice %50 {offsets = [0, 64], sizes = [8, 32], strides = [1, 1]} : vector<8x128xf32> to vector<8x32xf32>
      %54 = vector.extract_strided_slice %50 {offsets = [0, 96], sizes = [8, 32], strides = [1, 1]} : vector<8x128xf32> to vector<8x32xf32>
      %55 = arith.mulf %52, %arg27 : vector<8x32xf32>
      %56 = arith.mulf %51, %53 : vector<8x32xf32>
      %57 = arith.addf %55, %56 : vector<8x32xf32>
      %58 = math.tanh %57 : vector<8x32xf32>
      %59 = arith.mulf %54, %58 : vector<8x32xf32>
      %60 = arith.truncf %59 : vector<8x32xf32> to vector<8x32xbf16>
      %c0_40 = arith.constant 0 : index
      %c0_41 = arith.constant 0 : index
      %61 = vector.load %arg6[%c0_40, %c0_41] : memref<32x128xbf16, #tpu.memory_space<vmem>>, vector<32x128xbf16>
      %cst_42 = arith.constant dense<0.000000e+00> : vector<8x128xf32>
      %62 = tpu.matmul %60, %61, %cst_42 {dimension_numbers = #tpu.dot_dimension_numbers<[1], [0], [0], [1], [0, 0, 1, 1], [], []>} : vector<8x32xbf16>, vector<32x128xbf16>, vector<8x128xf32> -> vector<8x128xf32>
      %63 = arith.truncf %arg26 : vector<8x32xf32> to vector<8x32xbf16>
      %c0_43 = arith.constant 0 : index
      %c0_44 = arith.constant 0 : index
      %64 = vector.load %arg7[%c0_43, %c0_44] : memref<32x128xbf16, #tpu.memory_space<vmem>>, vector<32x128xbf16>
      %cst_45 = arith.constant dense<0.000000e+00> : vector<8x128xf32>
      %65 = tpu.matmul %63, %64, %cst_45 {dimension_numbers = #tpu.dot_dimension_numbers<[1], [0], [0], [1], [0, 0, 1, 1], [], []>} : vector<8x32xbf16>, vector<32x128xbf16>, vector<8x128xf32> -> vector<8x128xf32>
      %66 = arith.addf %62, %65 : vector<8x128xf32>
      %c0_46 = arith.constant 0 : index
      %c0_47 = arith.constant 0 : index
      %67 = vector.load %arg8[%c0_46, %c0_47] : memref<1x128xf32, #tpu.memory_space<vmem>>, vector<1x128xf32>
      %68 = vector.broadcast %67 : vector<1x128xf32> to vector<8x128xf32>
      %69 = arith.addf %66, %68 : vector<8x128xf32>
      %cst_48 = arith.constant 5.000000e-01 : f32
      %70 = vector.broadcast %cst_48 : f32 to vector<8x128xf32>
      %71 = arith.mulf %70, %69 : vector<8x128xf32>
      %72 = arith.select %5, %69, %71 : vector<8x128xi1>, vector<8x128xf32>
      %73 = math.tanh %72 : vector<8x128xf32>
      %cst_49 = arith.constant 5.000000e-01 : f32
      %74 = vector.broadcast %cst_49 : f32 to vector<8x128xf32>
      %75 = arith.mulf %74, %73 : vector<8x128xf32>
      %cst_50 = arith.constant 5.000000e-01 : f32
      %76 = vector.broadcast %cst_50 : f32 to vector<8x128xf32>
      %77 = arith.addf %75, %76 : vector<8x128xf32>
      %78 = arith.select %5, %73, %77 : vector<8x128xi1>, vector<8x128xf32>
      %79 = vector.extract_strided_slice %78 {offsets = [0, 0], sizes = [8, 32], strides = [1, 1]} : vector<8x128xf32> to vector<8x32xf32>
      %80 = vector.extract_strided_slice %78 {offsets = [0, 32], sizes = [8, 32], strides = [1, 1]} : vector<8x128xf32> to vector<8x32xf32>
      %81 = vector.extract_strided_slice %78 {offsets = [0, 64], sizes = [8, 32], strides = [1, 1]} : vector<8x128xf32> to vector<8x32xf32>
      %82 = vector.extract_strided_slice %78 {offsets = [0, 96], sizes = [8, 32], strides = [1, 1]} : vector<8x128xf32> to vector<8x32xf32>
      %83 = arith.mulf %80, %arg28 : vector<8x32xf32>
      %84 = arith.mulf %79, %81 : vector<8x32xf32>
      %85 = arith.addf %83, %84 : vector<8x32xf32>
      %86 = math.tanh %85 : vector<8x32xf32>
      %87 = arith.mulf %82, %86 : vector<8x32xf32>
      scf.yield %59, %87, %57, %85 : vector<8x32xf32>, vector<8x32xf32>, vector<8x32xf32>, vector<8x32xf32>
    }
    %c6_i32_13 = arith.constant 6 : i32
    %c0_14 = arith.constant 0 : index
    %c0_15 = arith.constant 0 : index
    %19 = vector.load %arg21[%c0_14, %c0_15] : memref<64x128xf32, #tpu.memory_space<vmem>>, vector<8x128xf32>
    %c0_16 = arith.constant 0 : index
    %c0_17 = arith.constant 0 : index
    %20 = vector.load %arg23[%c0_16, %c0_17] : memref<8x128xf32, #tpu.memory_space<vmem>>, vector<8x128xf32>
    tpu.vector_store %arg23[%c0_16, %c0_17], %19 {strides = array<i32>} : memref<8x128xf32, #tpu.memory_space<vmem>>, vector<8x128xf32>,
    %c0_i32_18 = arith.constant 0 : i32
    %c8_i32 = arith.constant 8 : i32
    %21 = arith.addi %c0_i32_18, %c8_i32 : i32
    %c1_i32_19 = arith.constant 1 : i32
    %22:4 = scf.for %arg24 = %c0_i32_18 to %21 step %c1_i32_19 iter_args(%arg25 = %18#0, %arg26 = %18#1, %arg27 = %18#2, %arg28 = %18#3) -> (vector<8x32xf32>, vector<8x32xf32>, vector<8x32xf32>, vector<8x32xf32>)  : i32 {
      %c0_30 = arith.constant 0 : index
      %c0_31 = arith.constant 0 : index
      %31 = vector.load %arg23[%c0_30, %c0_31] : memref<8x128xf32, #tpu.memory_space<vmem>>, vector<8x128xf32>
      %32 = arith.truncf %arg25 : vector<8x32xf32> to vector<8x32xbf16>
      %c0_32 = arith.constant 0 : index
      %c0_33 = arith.constant 0 : index
      %33 = vector.load %arg10[%c0_32, %c0_33] : memref<32x128xbf16, #tpu.memory_space<vmem>>, vector<32x128xbf16>
      %cst_34 = arith.constant dense<0.000000e+00> : vector<8x128xf32>
      %34 = tpu.matmul %32, %33, %cst_34 {dimension_numbers = #tpu.dot_dimension_numbers<[1], [0], [0], [1], [0, 0, 1, 1], [], []>} : vector<8x32xbf16>, vector<32x128xbf16>, vector<8x128xf32> -> vector<8x128xf32>
      %35 = arith.addf %31, %34 : vector<8x128xf32>
      %c0_35 = arith.constant 0 : index
      %c0_36 = arith.constant 0 : index
      %36 = vector.load %arg11[%c0_35, %c0_36] : memref<1x128xf32, #tpu.memory_space<vmem>>, vector<1x128xf32>
      %37 = vector.broadcast %36 : vector<1x128xf32> to vector<8x128xf32>
      %38 = arith.addf %35, %37 : vector<8x128xf32>
      %cst_37 = arith.constant 5.000000e-01 : f32
      %39 = vector.broadcast %cst_37 : f32 to vector<8x128xf32>
      %40 = arith.mulf %39, %38 : vector<8x128xf32>
      %41 = arith.select %5, %38, %40 : vector<8x128xi1>, vector<8x128xf32>
      %42 = math.tanh %41 : vector<8x128xf32>
      %cst_38 = arith.constant 5.000000e-01 : f32
      %43 = vector.broadcast %cst_38 : f32 to vector<8x128xf32>
      %44 = arith.mulf %43, %42 : vector<8x128xf32>
      %cst_39 = arith.constant 5.000000e-01 : f32
      %45 = vector.broadcast %cst_39 : f32 to vector<8x128xf32>
      %46 = arith.addf %44, %45 : vector<8x128xf32>
      %47 = arith.select %5, %42, %46 : vector<8x128xi1>, vector<8x128xf32>
      %48 = vector.extract_strided_slice %47 {offsets = [0, 0], sizes = [8, 32], strides = [1, 1]} : vector<8x128xf32> to vector<8x32xf32>
      %49 = vector.extract_strided_slice %47 {offsets = [0, 32], sizes = [8, 32], strides = [1, 1]} : vector<8x128xf32> to vector<8x32xf32>
      %50 = vector.extract_strided_slice %47 {offsets = [0, 64], sizes = [8, 32], strides = [1, 1]} : vector<8x128xf32> to vector<8x32xf32>
      %51 = vector.extract_strided_slice %47 {offsets = [0, 96], sizes = [8, 32], strides = [1, 1]} : vector<8x128xf32> to vector<8x32xf32>
      %52 = arith.mulf %49, %arg27 : vector<8x32xf32>
      %53 = arith.mulf %48, %50 : vector<8x32xf32>
      %54 = arith.addf %52, %53 : vector<8x32xf32>
      %55 = math.tanh %54 : vector<8x32xf32>
      %56 = arith.mulf %51, %55 : vector<8x32xf32>
      %57 = arith.truncf %56 : vector<8x32xf32> to vector<8x32xbf16>
      %c0_40 = arith.constant 0 : index
      %c0_41 = arith.constant 0 : index
      %58 = vector.load %arg12[%c0_40, %c0_41] : memref<32x128xbf16, #tpu.memory_space<vmem>>, vector<32x128xbf16>
      %cst_42 = arith.constant dense<0.000000e+00> : vector<8x128xf32>
      %59 = tpu.matmul %57, %58, %cst_42 {dimension_numbers = #tpu.dot_dimension_numbers<[1], [0], [0], [1], [0, 0, 1, 1], [], []>} : vector<8x32xbf16>, vector<32x128xbf16>, vector<8x128xf32> -> vector<8x128xf32>
      %60 = arith.truncf %arg26 : vector<8x32xf32> to vector<8x32xbf16>
      %c0_43 = arith.constant 0 : index
      %c0_44 = arith.constant 0 : index
      %61 = vector.load %arg13[%c0_43, %c0_44] : memref<32x128xbf16, #tpu.memory_space<vmem>>, vector<32x128xbf16>
      %cst_45 = arith.constant dense<0.000000e+00> : vector<8x128xf32>
      %62 = tpu.matmul %60, %61, %cst_45 {dimension_numbers = #tpu.dot_dimension_numbers<[1], [0], [0], [1], [0, 0, 1, 1], [], []>} : vector<8x32xbf16>, vector<32x128xbf16>, vector<8x128xf32> -> vector<8x128xf32>
      %63 = arith.addf %59, %62 : vector<8x128xf32>
      %c0_46 = arith.constant 0 : index
      %c0_47 = arith.constant 0 : index
      %64 = vector.load %arg14[%c0_46, %c0_47] : memref<1x128xf32, #tpu.memory_space<vmem>>, vector<1x128xf32>
      %65 = vector.broadcast %64 : vector<1x128xf32> to vector<8x128xf32>
      %66 = arith.addf %63, %65 : vector<8x128xf32>
      %cst_48 = arith.constant 5.000000e-01 : f32
      %67 = vector.broadcast %cst_48 : f32 to vector<8x128xf32>
      %68 = arith.mulf %67, %66 : vector<8x128xf32>
      %69 = arith.select %5, %66, %68 : vector<8x128xi1>, vector<8x128xf32>
      %70 = math.tanh %69 : vector<8x128xf32>
      %cst_49 = arith.constant 5.000000e-01 : f32
      %71 = vector.broadcast %cst_49 : f32 to vector<8x128xf32>
      %72 = arith.mulf %71, %70 : vector<8x128xf32>
      %cst_50 = arith.constant 5.000000e-01 : f32
      %73 = vector.broadcast %cst_50 : f32 to vector<8x128xf32>
      %74 = arith.addf %72, %73 : vector<8x128xf32>
      %75 = arith.select %5, %70, %74 : vector<8x128xi1>, vector<8x128xf32>
      %76 = vector.extract_strided_slice %75 {offsets = [0, 0], sizes = [8, 32], strides = [1, 1]} : vector<8x128xf32> to vector<8x32xf32>
      %77 = vector.extract_strided_slice %75 {offsets = [0, 32], sizes = [8, 32], strides = [1, 1]} : vector<8x128xf32> to vector<8x32xf32>
      %78 = vector.extract_strided_slice %75 {offsets = [0, 64], sizes = [8, 32], strides = [1, 1]} : vector<8x128xf32> to vector<8x32xf32>
      %79 = vector.extract_strided_slice %75 {offsets = [0, 96], sizes = [8, 32], strides = [1, 1]} : vector<8x128xf32> to vector<8x32xf32>
      %80 = arith.mulf %77, %arg28 : vector<8x32xf32>
      %81 = arith.mulf %76, %78 : vector<8x32xf32>
      %82 = arith.addf %80, %81 : vector<8x32xf32>
      %83 = math.tanh %82 : vector<8x32xf32>
      %84 = arith.mulf %79, %83 : vector<8x32xf32>
      %c8_i32_51 = arith.constant 8 : i32
      %85 = arith.muli %arg24, %c8_i32_51 : i32
      %86 = tpu.assume_multiple %85, 8 : i32
      %87 = arith.index_cast %86 : i32 to index
      %c0_52 = arith.constant 0 : index
      %88 = vector.load %arg22[%87, %c0_52] : memref<64x32xf32, #tpu.memory_space<vmem>>, vector<8x32xf32>
      tpu.vector_store %arg22[%87, %c0_52], %84 {strides = array<i32>} : memref<64x32xf32, #tpu.memory_space<vmem>>, vector<8x32xf32>,
      %c1_i32_53 = arith.constant 1 : i32
      %89 = arith.addi %arg24, %c1_i32_53 : i32
      %c7_i32 = arith.constant 7 : i32
      %90 = arith.minsi %89, %c7_i32 : i32
      %91 = arith.index_cast %arg24 : i32 to index
      %92 = memref.load %arg0[%91] : memref<8xi32, #tpu.memory_space<smem>>
      %c0_i32_54 = arith.constant 0 : i32
      %93 = arith.cmpi eq, %92, %c0_i32_54 : i32
      %c1_i32_55 = arith.constant 1 : i32
      %94 = arith.addi %arg24, %c1_i32_55 : i32
      %c8_i32_56 = arith.constant 8 : i32
      %95 = arith.cmpi slt, %94, %c8_i32_56 : i32
      %96 = arith.andi %93, %95 : i1
      %97 = arith.extui %96 : i1 to i32
      %c0_i32_57 = arith.constant 0 : i32
      %98 = arith.cmpi ne, %97, %c0_i32_57 : i32
      scf.if %98 {
        %102 = arith.truncf %84 : vector<8x32xf32> to vector<8x32xbf16>
        %c0_59 = arith.constant 0 : index
        %c0_60 = arith.constant 0 : index
        %103 = vector.load %arg17[%c0_59, %c0_60] : memref<32x128xbf16, #tpu.memory_space<vmem>>, vector<32x128xbf16>
        %cst_61 = arith.constant dense<0.000000e+00> : vector<8x128xf32>
        %104 = tpu.matmul %102, %103, %cst_61 {dimension_numbers = #tpu.dot_dimension_numbers<[1], [0], [0], [1], [0, 0, 1, 1], [], []>} : vector<8x32xbf16>, vector<32x128xbf16>, vector<8x128xf32> -> vector<8x128xf32>
        %c0_62 = arith.constant 0 : index
        %c0_63 = arith.constant 0 : index
        %105 = vector.load %arg18[%c0_62, %c0_63] : memref<1x128xf32, #tpu.memory_space<vmem>>, vector<1x128xf32>
        %106 = vector.broadcast %105 : vector<1x128xf32> to vector<8x128xf32>
        %107 = arith.addf %104, %106 : vector<8x128xf32>
        %c0_64 = arith.constant 0 : index
        %c0_65 = arith.constant 0 : index
        %108 = vector.load %arg23[%c0_64, %c0_65] : memref<8x128xf32, #tpu.memory_space<vmem>>, vector<8x128xf32>
        tpu.vector_store %arg23[%c0_64, %c0_65], %107 {strides = array<i32>} : memref<8x128xf32, #tpu.memory_space<vmem>>, vector<8x128xf32>,
      } else {
      }
      %true = arith.constant true
      %99 = arith.xori %96, %true : i1
      %100 = arith.extui %99 : i1 to i32
      %c0_i32_58 = arith.constant 0 : i32
      %101 = arith.cmpi ne, %100, %c0_i32_58 : i32
      scf.if %101 {
        %c8_i32_59 = arith.constant 8 : i32
        %102 = arith.muli %90, %c8_i32_59 : i32
        %103 = tpu.assume_multiple %102, 8 : i32
        %104 = arith.index_cast %103 : i32 to index
        %c0_60 = arith.constant 0 : index
        %105 = vector.load %arg21[%104, %c0_60] : memref<64x128xf32, #tpu.memory_space<vmem>>, vector<8x128xf32>
        %c0_61 = arith.constant 0 : index
        %c0_62 = arith.constant 0 : index
        %106 = vector.load %arg23[%c0_61, %c0_62] : memref<8x128xf32, #tpu.memory_space<vmem>>, vector<8x128xf32>
        tpu.vector_store %arg23[%c0_61, %c0_62], %105 {strides = array<i32>} : memref<8x128xf32, #tpu.memory_space<vmem>>, vector<8x128xf32>,
      } else {
      }
      scf.yield %56, %84, %54, %82 : vector<8x32xf32>, vector<8x32xf32>, vector<8x32xf32>, vector<8x32xf32>
    }
    %c8_i32_20 = arith.constant 8 : i32
    %c0_21 = arith.constant 0 : index
    %c0_22 = arith.constant 0 : index
    %23 = vector.load %arg22[%c0_21, %c0_22] : memref<64x32xf32, #tpu.memory_space<vmem>>, vector<64x32xf32>
    %24 = arith.truncf %23 : vector<64x32xf32> to vector<64x32xbf16>
    %c0_23 = arith.constant 0 : index
    %c0_24 = arith.constant 0 : index
    %25 = vector.load %arg15[%c0_23, %c0_24] : memref<32x128xbf16, #tpu.memory_space<vmem>>, vector<32x128xbf16>
    %cst_25 = arith.constant dense<0.000000e+00> : vector<64x128xf32>
    %26 = tpu.matmul %24, %25, %cst_25 {dimension_numbers = #tpu.dot_dimension_numbers<[1], [0], [0], [1], [0, 0, 1, 1], [], []>} : vector<64x32xbf16>, vector<32x128xbf16>, vector<64x128xf32> -> vector<64x128xf32>
    %c0_26 = arith.constant 0 : index
    %c0_27 = arith.constant 0 : index
    %27 = vector.load %arg16[%c0_26, %c0_27] : memref<1x128xf32, #tpu.memory_space<vmem>>, vector<1x128xf32>
    %28 = vector.broadcast %27 : vector<1x128xf32> to vector<64x128xf32>
    %29 = arith.addf %26, %28 : vector<64x128xf32>
    %c0_28 = arith.constant 0 : index
    %c0_29 = arith.constant 0 : index
    %30 = vector.load %arg19[%c0_28, %c0_29] : memref<64x128xf32, #tpu.memory_space<vmem>>, vector<64x128xf32>
    tpu.vector_store %arg19[%c0_28, %c0_29], %29 {strides = array<i32>} : memref<64x128xf32, #tpu.memory_space<vmem>>, vector<64x128xf32>,
    return
  }
}

</mosaic_0001>

<bundles_post_ra>
// kernel: seq2seq_forward.1
= control target key start
LH: loop header
LB: loop body
LE: loop exit
PB: predicated region body
PF: predicated region fallthrough
CT: control target
= control target key end

     0   :  { %s1871_s0 = inlined_call_operand.vmem [shape: s32[8], index: 0, kind: input, shape index: {}]   ;;  %s1872_s1 = inlined_call_operand.vmem [shape: f32[48,8], index: 1, kind: input, shape index: {}]   ;;  %s1873_s2 = inlined_call_operand.vmem [shape: f32[64,8], index: 2, kind: input, shape index: {}]   ;;  %s1874_s3 = inlined_call_operand.vmem [shape: bf16[8,128], index: 3, kind: input, shape index: {}]   ;;  %s1875_s4 = inlined_call_operand.vmem [shape: bf16[32,128], index: 4, kind: input, shape index: {}]   ;;  %s1876_s5 = inlined_call_operand.vmem [shape: f32[1,128], index: 5, kind: input, shape index: {}]   ;;  %s1877_s6 = inlined_call_operand.vmem [shape: bf16[32,128], index: 6, kind: input, shape index: {}]   ;;  %s1878_s7 = inlined_call_operand.vmem [shape: bf16[32,128], index: 7, kind: input, shape index: {}]   ;;  %s1879_s8 = inlined_call_operand.vmem [shape: f32[1,128], index: 8, kind: input, shape index: {}]   ;;  %s1880_s9 = inlined_call_operand.vmem [shape: bf16[8,128], index: 9, kind: input, shape index: {}]   ;;  %s1881_s10 = inlined_call_operand.vmem [shape: bf16[32,128], index: 10, kind: input, shape index: {}]   ;;  %s1882_s11 = inlined_call_operand.vmem [shape: f32[1,128], index: 11, kind: input, shape index: {}]   ;;  %s1883_s12 = inlined_call_operand.vmem [shape: bf16[32,128], index: 12, kind: input, shape index: {}]   ;;  %s1884_s13 = inlined_call_operand.vmem [shape: bf16[32,128], index: 13, kind: input, shape index: {}]   ;;  %s1885_s14 = inlined_call_operand.vmem [shape: f32[1,128], index: 14, kind: input, shape index: {}]   ;;  %s1886_s15 = inlined_call_operand.vmem [shape: bf16[32,128], index: 15, kind: input, shape index: {}]   ;;  %s1887_s16 = inlined_call_operand.vmem [shape: f32[1,128], index: 16, kind: input, shape index: {}]   ;;  %s1888_s17 = inlined_call_operand.vmem [shape: bf16[32,128], index: 17, kind: input, shape index: {}]   ;;  %s1889_s18 = inlined_call_operand.vmem [shape: f32[1,128], index: 18, kind: input, shape index: {}]   ;;  %s1890_s19 = inlined_call_operand.vmem [shape: f32[64,128], index: 19, kind: output, shape index: {}]  }
   0x1   :  { %1893 = sst [smem:[#allocation9_spill]] %s1871_s0 }
   0x2   :  { %1894 = sst [smem:[#allocation10_spill]] %s1872_s1 }
   0x3   :  { %1895 = sst [smem:[#allocation11_spill]] %s1873_s2 }
   0x4   :  { %1896 = sst [smem:[#allocation12_spill]] %s1874_s3 }
   0x5   :  { %24 = vsyncpa [#allocation7], 0  ;;  %s1897_s20 = sld [smem:[#allocation9_spill]] }
   0xb   :  { %s31_s21 = sshll.u32 %s1897_s20, 4  ;;  %s32_s21 = int_to_ptr.vmem [resolvable:$true] %s31_s21 }
   0xc   :  { %s1364_s1 = scalar_lea.vmem %s32_s21, 16  ;;  %p1369_p1 = scmp.lt.s32.totalorder %s32_s21, %s32_s21 }
   0xd   :  { %p1365_p0 = scmp.ne.s32.totalorder %s32_s21, %s1364_s1  ;;  %p1370_p2 = scmp.lt.s32.totalorder %s1364_s1, %s1364_s1 }
   0xf   :  { %p1371_p3 = por %p1370_p2, %p1369_p1 }
  0x11   :  { %p1372_p4 = pnand %p1371_p3, %p1365_p0 }
  0x13   :  { %1375 = shalt.err (!%p1372_p4)
}
  0x14   :  { %s1458_s22 = smov [#allocation6]  }
  0x15   :  { %34 = dma.vmem_to_smem %s32_s21, 16, %s1458_s22, [#allocation7]  }
  0x16   :  { %1416 = dma.done.wait [#allocation7], 16  }
  0x17   :  { %1417 = vsyncadd [#allocation7], 4294967280 }
  0x18   :  { %74 = sfence }
  0x19   :  { %v76_v0 = vlaneseq  ;;  %s1898_s24 = sld [smem:[#allocation12_spill]]  ;;  %vm101_vm0 = vcmask 1043456   ;;  %s1899_s26 = sld [smem:[#allocation10_spill]]  ;;  %v1459_v3 = vmov 0.0   ;;  %vm1460_vm1 = vmmov 0  }
  0x1a   :  { %1141 = vmatprep.subr.bf16.mxu0 %v1459_v3  ;;  %1143 = vmatprep.mubr.msk.bf16.mxu0 %vm1460_vm1, %v1459_v3  ;;  %v180_v6 = vld [vmem:[%s1880_s9] sm:$0xf]  ;;  %s1900_s21 = sld [smem:[#allocation11_spill]]  ;;  %vm91_vm2 = vcmask 64512   ;;  %v1637_v49 = vmov 0.0   ;;  %v1639_v50 = vmov 0.0  }
  0x1b   :  { %v77_v8 = vand.u32 127, %v76_v0  ;;  %1237 = vmatprep.subr.msk.bf16.mxu1 %vm101_vm0, %v180_v6  ;;  %v194_v10 = vsel %vm101_vm0, %v180_v6, 0  ;;  %v1641_v51 = vmov 0.0   ;;  %v1643_v52 = vmov 0.0  }
  0x1c   :  { %1156 = vmatpush3.bf16.msra.mxu1 %v194_v10 }
  0x1d   :  { %vm78_vm3 = vcmp.ge.s32.totalorder %v77_v8, 64  ;;  %vm79_vm4 = vcmp.lt.s32.totalorder %v77_v8, 96 }
  0x1e   :  { %vm1606_vm5 = vmand %vm78_vm3, %vm79_vm4 }
  0x1f   :  { %v90_v1 = vld [vmem:[%s1898_s24] sm:$0xf]  ;;  %v82_v5 = vld [vmem:[%s1899_s26 + $0x8] sm:$0xff]  ;;  %v83_v20 = vld [vmem:[%s1899_s26 + $0x10] sm:$0xff] }
  0x20   :  { %v81_v2 = vld [vmem:[%s1899_s26] sm:$0xff]  ;;  %v103_v4 = vsel %vm101_vm0, %v90_v1, 0  ;;  %v169_v11 = vld [vmem:[%s1900_s21 + $0x8] sm:$0xff]  ;;  %v170_v12 = vld [vmem:[%s1900_s21 + $0x10] sm:$0xff] }
  0x21   :  { %v168_v7 = vld [vmem:[%s1900_s21] sm:$0xff]  ;;  %1142 = vmatpush3.bf16.msra.mxu0 %v103_v4  ;;  %v87_v9 = vpack.c.bf16 %v82_v5, %v81_v2  ;;  %v171_v13 = vld [vmem:[%s1900_s21 + $0x18] sm:$0xff]  ;;  %v173_v17 = vld [vmem:[%s1900_s21 + $0x28] sm:$0xff] }
  0x22   :  { %v176_v14 = vpack.c.bf16 %v169_v11, %v168_v7  ;;  %v177_v15 = vpack.c.bf16 %v171_v13, %v170_v12  ;;  %v172_v16 = vld [vmem:[%s1900_s21 + $0x20] sm:$0xff]  ;;  %v84_v21 = vld [vmem:[%s1899_s26 + $0x18] sm:$0xff]  ;;  %v174_v22 = vld [vmem:[%s1900_s21 + $0x30] sm:$0xff] }
  0x23   :  { %v178_v19 = vpack.c.bf16 %v173_v17, %v172_v16  ;;  %v175_v23 = vld [vmem:[%s1900_s21 + $0x38] sm:$0xff]  ;;  %v88_v24 = vpack.c.bf16 %v84_v21, %v83_v20  ;;  %v85_v26 = vld [vmem:[%s1899_s26 + $0x20] sm:$0xff]  ;;  %v86_v27 = vld [vmem:[%s1899_s26 + $0x28] sm:$0xff]  ;;  %s1645_s26 = smov 0  }
  0x24   :  { %1144 = vmatmul.mubr.msk.bf16.vlgmr.msra.gmra.mrb[0].mxu0 %vm91_vm2, %v87_v9  ;;  %1157 = vmatprep.mubr.msk.bf16.mxu1 %vm91_vm2, %v176_v14  ;;  %v179_v25 = vpack.c.bf16 %v175_v23, %v174_v22  ;;  %v89_v28 = vpack.c.bf16 %v86_v27, %v85_v26 }
  0x25   :  { %1158 = vmatmul.mubr.msk.bf16.vlgmr.msra.gmra.mrb[0].mxu1 %vm91_vm2, %v177_v15  ;;  %1147 = vmatprep.mubr.msk.bf16.mxu0 %vm1460_vm1, %v1459_v3 }
  0x26   :  { %1161 = vmatprep.mubr.msk.bf16.mxu1 %vm91_vm2, %v178_v19 }
  0x2c   :  { %1148 = vmatmul.mubr.msk.bf16.gmra.mrb[4].mxu0 %vm91_vm2, %v88_v24 }
  0x2d   :  { %1162 = vmatmul.mubr.msk.bf16.gmra.mrb[4].mxu1 %vm91_vm2, %v179_v25  ;;  %1151 = vmatprep.mubr.msk.bf16.mxu0 %vm1460_vm1, %v1459_v3 }
  0x34   :  { %1152 = vmatmul.mubr.msk.bf16.gmra.mrb[8].mxu0 %vm91_vm2, %v89_v28 }
  0xf7   :  { %v139_v29 = vpop.f32.mrb[0].mxu0 }
  0xf8   :  { %162 = vst [vmem:[#allocation2] sm:$0xff] %v139_v29  ;;  %v1145_v30 = vpop.f32.mrb[1].mxu0  ;;  %v1159_v31 = vpop.f32.mrb[0].mxu1 }
  0xf9   :  { %v142_v32 = vpop.f32.mrb[2].mxu0  ;;  %263 = vst [vmem:[#allocation3 + $0x10] sm:$0xff] %v1159_v31  ;;  %v230_v33 = vpop.f32.mrb[1].mxu1 }
  0xfa   :  { %163 = vst [vmem:[#allocation2 + $0x8] sm:$0xff] %v142_v32  ;;  %v1146_v34 = vpop.f32.mrb[3].mxu0  ;;  %261 = vst [vmem:[#allocation3] sm:$0xff] %v230_v33  ;;  %v1160_v35 = vpop.f32.mrb[2].mxu1 }
  0xfb   :  { %264 = vst [vmem:[#allocation3 + $0x18] sm:$0xff] %v1160_v35  ;;  %v233_v36 = vpop.f32.mrb[3].mxu1 }
  0xfc   :  { %262 = vst [vmem:[#allocation3 + $0x8] sm:$0xff] %v233_v36 }
  0xff   :  { %v147_v37 = vpop.f32.mrb[4].mxu0 }
 0x100   :  { %164 = vst [vmem:[#allocation2 + $0x10] sm:$0xff] %v147_v37  ;;  %v1149_v38 = vpop.f32.mrb[5].mxu0  ;;  %v1163_v39 = vpop.f32.mrb[4].mxu1 }
 0x101   :  { %v150_v40 = vpop.f32.mrb[6].mxu0  ;;  %267 = vst [vmem:[#allocation3 + $0x30] sm:$0xff] %v1163_v39  ;;  %v246_v41 = vpop.f32.mrb[5].mxu1 }
 0x102   :  { %165 = vst [vmem:[#allocation2 + $0x18] sm:$0xff] %v150_v40  ;;  %v1150_v42 = vpop.f32.mrb[7].mxu0  ;;  %265 = vst [vmem:[#allocation3 + $0x20] sm:$0xff] %v246_v41  ;;  %v1164_v43 = vpop.f32.mrb[6].mxu1 }
 0x103   :  { %268 = vst [vmem:[#allocation3 + $0x38] sm:$0xff] %v1164_v43  ;;  %v249_v44 = vpop.f32.mrb[7].mxu1 }
 0x104   :  { %266 = vst [vmem:[#allocation3 + $0x28] sm:$0xff] %v249_v44 }
 0x107   :  { %v155_v45 = vpop.f32.mrb[8].mxu0 }
 0x108   :  { %166 = vst [vmem:[#allocation2 + $0x20] sm:$0xff] %v155_v45  ;;  %v1153_v46 = vpop.f32.mrb[9].mxu0 }
 0x109   :  { %v158_v47 = vpop.f32.mrb[10].mxu0 }
 0x10a   :  { %167 = vst [vmem:[#allocation2 + $0x28] sm:$0xff] %v158_v47  ;;  %v1154_v48 = vpop.f32.mrb[11].mxu0 }
 0x10b LB: > { %v1461_v53 = vmov 0.0   ;;  %v1332_v54 = vld [vmem:[%s1875_s4] sm:$0xff]   ;;  %v282_v55 = vpack.c.bf16 %v1432_v52, %v1432_v52  ;;  %vm1462_vm6 = vmmov 0   ;;  %v1333_v56 = vld [vmem:[%s1875_s4 + $0x8] sm:$0xff]   ;;  %s1463_s0 = smov 32   ;;  %vm302_vm7 = vcmask 261120   ;;  %s1436_s26 = sphi %s1645_s26, %s274_s26   ;;  %v1432_v52 = vphi %v1643_v52, %v1907_v52   ;;  %v1428_v51 = vphi %v1641_v51, %v1906_v51   ;;  %v1424_v50 = vphi %v1639_v50, %v1905_v50   ;;  %v1420_v49 = vphi %v1637_v49, %v1904_v49  }
 0x10c   : > { %1165 = vmatprep.subr.bf16.mxu0 %v1461_v53  ;;  %1173 = vmatprep.subr.bf16.mxu1 %v1461_v53  ;;  %s1069_s30 = sshll.u32 %s1436_s26, 3  ;;  %v1073_v60 = vld [vmem:[%s1876_s5] ss:$0 sm:$0xff]  ;;  %s1464_s2 = smov 64   ;;  %v383_v12 = vpack.c.bf16 %v1428_v51, %v1428_v51  ;;  %v1336_v16 = vld [vmem:[%s1878_s7 + $0x8] sm:$0xff]  }
 0x10d   : > { %1169 = vmatprep.mubr.msk.bf16.mxu0 %vm1462_vm6, %v1461_v53  ;;  %1177 = vmatprep.mubr.msk.bf16.mxu1 %vm1462_vm6, %v1461_v53  ;;  %s280_s20 = scalar_lea.vmem [#allocation2], %s1069_s30  ;;  %v1334_v14 = vld [vmem:[%s1878_s7] sm:$0xff]   ;;  %v1337_v17 = vld [vmem:[%s1877_s6 + $0x8] sm:$0xff]   ;;  %s274_s26 = sadd.s32 1, %s1436_s26  }
 0x10e   : > { %1166 = vmatpush3.bf16.msra.mxu0 %v1332_v54  ;;  %288 = vrot.lane.b32.xlu0 %v282_v55, %s1463_s0  ;;  %v1335_v15 = vld [vmem:[%s1877_s6] sm:$0xff]   ;;  %p271_p5 = scmp.ge.s32.totalorder %s274_s26, 6  }
 0x10f   : > { %1167 = vmatprep.subr.bf16.mxu0 %v1461_v53  ;;  %1174 = vmatpush3.bf16.msra.mxu1 %v1334_v14  ;;  %v1080_v30 = vld [vmem:[%s1879_s8] ss:$0 sm:$0xff] }
 0x110   : > { %1175 = vmatprep.subr.bf16.mxu1 %v1461_v53 }
 0x111   : > { %v281_v58 = vld [vmem:[%s280_s20] sm:$0xff] }
 0x112   : > { %1168 = vmatpush3.bf16.msra.mxu0 %v1333_v56 }
 0x113   : > { %1181 = vmatprep.subr.bf16.mxu0 %v1461_v53  ;;  %1176 = vmatpush3.bf16.msra.mxu1 %v1336_v16 }
 0x180   : > { %v289_v57 = vpop.permute.xlu0 %288 }
 0x181   : > { %1170 = vmatmul.mubr.msk.bf16.vlgmr.msra.gmra.mrb[0].mxu0 %vm302_vm7, %v289_v57 }
 0x182   : > { %1185 = vmatprep.mubr.msk.bf16.mxu0 %vm1462_vm6, %v1461_v53  ;;  %1182 = vmatpush3.bf16.msra.mxu0 %v1335_v15 }
 0x183   : > { %1183 = vmatprep.subr.bf16.mxu0 %v1461_v53 }
 0x186   : > { %1184 = vmatpush3.bf16.msra.mxu0 %v1337_v17 }
 0x254   : > { %v340_v59 = vpop.f32.mrb[0].mxu0 }
 0x255   : > { %v346_v61 = vadd.f32 %v340_v59, %v281_v58  ;;  %v1171_v62 = vpop.f32.mrb[1].mxu0 }
 0x256   : > { %v343_v63 = vpop.f32.mrb[2].mxu0 }
 0x257   : > { %v354_v0 = vadd.f32 %v1073_v60, %v346_v61  ;;  %v1172_v1 = vpop.f32.mrb[3].mxu0 }
 0x259   : > { %v355_v2 = vmul.f32 0.5, %v354_v0 }
 0x25b   : > { %v356_v3 = vsel %vm1606_vm5, %v354_v0, %v355_v2 }
 0x25c   : > { %1338 = vtanh.f32 %v356_v3 }
 0x266   : > { %v1339_v4 = vpop.eup %1338 }
 0x267   : > { %v358_v5 = vmul.f32 0.5, %v1339_v4 }
 0x269   : > { %v359_v6 = vadd.f32 0.5, %v358_v5 }
 0x26b   : > { %v360_v7 = vsel %vm1606_vm5, %v1339_v4, %v359_v6 }
 0x26c   : > { %363 = vrot.lane.b32.xlu0 %v360_v7, %s1464_s2  ;;  %v361_v10 = vmul.f32 %v1424_v50, %v360_v7 }
 0x270   : > { %389 = vrot.lane.b32.xlu0 %v383_v12, %s1463_s0 }
 0x2de   : > { %v364_v8 = vpop.permute.xlu0 %363 }
 0x2df   : > { %v366_v9 = vmul.f32 %v364_v8, %v360_v7 }
 0x2e1   : > { %368 = vrot.lane.b32.xlu1 %v366_v9, %s1463_s0 }
 0x2e2   : > { %v390_v20 = vpop.permute.xlu0 %389 }
 0x2e3   : > { %1178 = vmatmul.mubr.msk.bf16.vlgmr.msra.gmra.mrb[0].mxu1 %vm302_vm7, %v390_v20 }
 0x353   : > { %v369_v11 = vpop.permute.xlu1 %368 }
 0x354   : > { %v1674_v50 = vadd.f32 %v369_v11, %v361_v10  }
 0x356   : > { %v1903_v13 = vmov %v1674_v50 }
 0x357   : > { %1340 = vtanh.f32 %v1903_v13  ;;  %v1905_v50 = vmov %v1903_v13 }
 0x361   : > { %v1341_v19 = vpop.eup %1340 }
 0x362   : > { %374 = vrot.lane.b32.xlu1 %v1341_v19, %s1464_s2 }
 0x3b6   : > { %v440_v25 = vpop.f32.mrb[0].mxu1 }
 0x3b7   : > { %v1179_v26 = vpop.f32.mrb[1].mxu1 }
 0x3b8   : > { %v443_v27 = vpop.f32.mrb[2].mxu1 }
 0x3b9   : > { %v1180_v28 = vpop.f32.mrb[3].mxu1 }
 0x3d4   : > { %v375_v21 = vpop.permute.xlu1 %374 }
 0x3d5   : > { %v377_v22 = vmul.f32 %v375_v21, %v360_v7  }
 0x3d7   : > { %v378_v23 = vpack.c.bf16 %v377_v22, %v377_v22  ;;  %v1907_v52 = vmov %v377_v22 }
 0x3d8   :  { %v535_v52 = vld [vmem:[#allocation3] sm:$0xff] (%p271_p5) }
 0x3d9   : > { %447 = vrot.lane.b32.xlu1 %v378_v23, %s1463_s0  ;;  %536 = vst [vmem:[#allocation5] sm:$0xff] (%p271_p5), %v535_v52 }
 0x44b   : > { %v448_v24 = vpop.permute.xlu1 %447 }
 0x44c   : > { %1186 = vmatmul.mubr.msk.bf16.vlgmr.msra.gmra.mrb[4].mxu0 %vm302_vm7, %v448_v24 }
 0x51f   : > { %v498_v29 = vpop.f32.mrb[4].mxu0 }
 0x520   : > { %v499_v31 = vadd.f32 %v498_v29, %v440_v25  ;;  %v1187_v32 = vpop.f32.mrb[5].mxu0 }
 0x521   : > { %v501_v33 = vpop.f32.mrb[6].mxu0 }
 0x522   : > { %v511_v34 = vadd.f32 %v1080_v30, %v499_v31  ;;  %v1188_v35 = vpop.f32.mrb[7].mxu0 }
 0x524   : > { %v512_v36 = vmul.f32 0.5, %v511_v34 }
 0x526   : > { %v513_v37 = vsel %vm1606_vm5, %v511_v34, %v512_v36 }
 0x527   : > { %1342 = vtanh.f32 %v513_v37 }
 0x531   : > { %v1343_v38 = vpop.eup %1342 }
 0x532   : > { %v515_v39 = vmul.f32 0.5, %v1343_v38 }
 0x534   : > { %v516_v40 = vadd.f32 0.5, %v515_v39 }
 0x536   : > { %v517_v41 = vsel %vm1606_vm5, %v1343_v38, %v516_v40 }
 0x537   : > { %520 = vrot.lane.b32.xlu0 %v517_v41, %s1464_s2  ;;  %v518_v44 = vmul.f32 %v1420_v49, %v517_v41 }
 0x5a9   : > { %v521_v42 = vpop.permute.xlu0 %520 }
 0x5aa   : > { %v523_v43 = vmul.f32 %v521_v42, %v517_v41 }
 0x5ac   : > { %525 = vrot.lane.b32.xlu1 %v523_v43, %s1463_s0  ;;  %s1726_s0 = smov (%p271_p5), 0  }
 0x61e   : > { %v526_v45 = vpop.permute.xlu1 %525 }
 0x61f   : > { %v528_v46 = vadd.f32 %v526_v45, %v518_v44  }
 0x621   : > { %1344 = vtanh.f32 %v528_v46  ;;  %v1904_v49 = vmov %v528_v46 }
 0x62b   : > { %v1345_v47 = vpop.eup %1344 }
 0x62c   : > { %531 = vrot.lane.b32.xlu0 %v1345_v47, %s1464_s2 }
 0x69b   :  { %273 = sbr.rel (!%p271_p5) target bundleno = 267 (0x10b), region = 125 }
 0x69e   : > { %v532_v48 = vpop.permute.xlu0 %531 }
 0x69f   : > { %v534_v53 = vmul.f32 %v532_v48, %v517_v41  }
 0x6a1   : > { %v1906_v51 = vmov %v534_v53 }
 0x6a2 LB: > { %v1465_v49 = vmov 0.0   ;;  %v1346_v50 = vld [vmem:[%s1881_s10] sm:$0xff]   ;;  %v548_v51 = vpack.c.bf16 %v1452_v22, %v1452_v22  ;;  %v1347_v54 = vld [vmem:[%s1881_s10 + $0x8] sm:$0xff]   ;;  %vm1466_vm8 = vmmov 0   ;;  %s1467_s8 = smov 32   ;;  %v547_v56 = vld [vmem:[#allocation5] sm:$0xff]  ;;  %v649_v10 = vpack.c.bf16 %v1448_v53, %v1448_v53  ;;  %s1456_s0 = sphi %s1726_s0, %s1909_s0   ;;  %v1452_v22 = vphi %v377_v22, %v1772_v22   ;;  %v1448_v53 = vphi %v534_v53, %v800_v53   ;;  %v1444_v13 = vphi %v1903_v13, %v1754_v13   ;;  %v1440_v46 = vphi %v528_v46, %v794_v46  }
 0x6a3   : > { %1189 = vmatprep.subr.bf16.mxu0 %v1465_v49  ;;  %1197 = vmatprep.subr.bf16.mxu1 %v1465_v49  ;;  %v1084_v58 = vld [vmem:[%s1882_s11] ss:$0 sm:$0xff]  ;;  %s1468_s1 = smov 64   ;;  %v1350_v14 = vld [vmem:[%s1884_s13 + $0x8] sm:$0xff]   ;;  %s1789_s29 = sadd.s32 1, %s1456_s0  }
 0x6a4   : > { %1193 = vmatprep.mubr.msk.bf16.mxu0 %vm1466_vm8, %v1465_v49  ;;  %1201 = vmatprep.mubr.msk.bf16.mxu1 %vm1466_vm8, %v1465_v49  ;;  %v1348_v11 = vld [vmem:[%s1884_s13] sm:$0xff]   ;;  %v1351_v15 = vld [vmem:[%s1883_s12 + $0x8] sm:$0xff]   ;;  %p809_p6 = scmp.lt.s32.totalorder %s1789_s29, 7  ;;  %s811_s30 = sld [smem:[#allocation6 + %s1456_s0]] }
 0x6a5   : > { %1190 = vmatpush3.bf16.msra.mxu0 %v1346_v50  ;;  %554 = vrot.lane.b32.xlu0 %v548_v51, %s1467_s8  ;;  %v1349_v12 = vld [vmem:[%s1883_s12] sm:$0xff]   ;;  %p813_p7 = scmp.lt.s32.totalorder %s1789_s29, 8  ;;  %s1092_s6 = sshll.u32 %s1456_s0, 3 }
 0x6a6   : > { %1191 = vmatprep.subr.bf16.mxu0 %v1465_v49  ;;  %1198 = vmatpush3.bf16.msra.mxu1 %v1348_v11  ;;  %v1091_v28 = vld [vmem:[%s1885_s14] ss:$0 sm:$0xff]  ;;  %s1794_s4 = scalar_select %p809_p6, %s1789_s29, 7 }
 0x6a7   : > { %1199 = vmatprep.subr.bf16.mxu1 %v1465_v49  ;;  %s806_s7 = scalar_lea.vmem [#allocation4], %s1092_s6 }
 0x6a9   : > { %1192 = vmatpush3.bf16.msra.mxu0 %v1347_v54 }
 0x6aa   : > { %1205 = vmatprep.subr.bf16.mxu0 %v1465_v49  ;;  %1200 = vmatpush3.bf16.msra.mxu1 %v1350_v14  ;;  %p812_p8 = scmp.eq.s32.totalorder %s811_s30, 0 }
 0x6ac   : > { %p1798_p9 = pnand %p813_p7, %p812_p8 }
 0x6ad   : > { %v1469_v52 = vmov (!%p1798_p9), 0.0   ;;  %vm1471_vm9 = vmmov (!%p1798_p9), 0   ;;  %v1361_v50 = vld [vmem:[%s1888_s17 + $0x8] sm:$0xff] (!%p1798_p9)   ;;  %v1093_v54 = vld [vmem:[%s1889_s18] ss:$0 sm:$0xff] (!%p1798_p9) }
 0x717   : > { %v555_v55 = vpop.permute.xlu0 %554 }
 0x718   : > { %1194 = vmatmul.mubr.msk.bf16.vlgmr.msra.gmra.mrb[0].mxu0 %vm302_vm7, %v555_v55 }
 0x719   : > { %1209 = vmatprep.mubr.msk.bf16.mxu0 %vm1466_vm8, %v1465_v49  ;;  %1206 = vmatpush3.bf16.msra.mxu0 %v1349_v12 }
 0x71a   : > { %1207 = vmatprep.subr.bf16.mxu0 %v1465_v49  ;;  %v1360_v49 = vld [vmem:[%s1888_s17] sm:$0xff] (!%p1798_p9)  }
 0x71d   : > { %1208 = vmatpush3.bf16.msra.mxu0 %v1351_v15 }
 0x71e   : > { %1213 = vmatprep.subr.bf16.mxu0 (!%p1798_p9), %v1469_v52 }
 0x7eb   : > { %v606_v57 = vpop.f32.mrb[0].mxu0 }
 0x7ec   : > { %v612_v59 = vadd.f32 %v606_v57, %v547_v56  ;;  %v1195_v60 = vpop.f32.mrb[1].mxu0 }
 0x7ed   : > { %v609_v61 = vpop.f32.mrb[2].mxu0 }
 0x7ee   : > { %v620_v62 = vadd.f32 %v1084_v58, %v612_v59  ;;  %v1196_v63 = vpop.f32.mrb[3].mxu0 }
 0x7f0   : > { %v621_v0 = vmul.f32 0.5, %v620_v62 }
 0x7f2   : > { %v622_v1 = vsel %vm1606_vm5, %v620_v62, %v621_v0 }
 0x7f3   : > { %1352 = vtanh.f32 %v622_v1 }
 0x7fd   : > { %v1353_v2 = vpop.eup %1352 }
 0x7fe   : > { %v624_v3 = vmul.f32 0.5, %v1353_v2 }
 0x800   : > { %v625_v4 = vadd.f32 0.5, %v624_v3 }
 0x802   : > { %v626_v5 = vsel %vm1606_vm5, %v1353_v2, %v625_v4 }
 0x803   : > { %629 = vrot.lane.b32.xlu0 %v626_v5, %s1468_s1  ;;  %v627_v8 = vmul.f32 %v1444_v13, %v626_v5 }
 0x807   : > { %655 = vrot.lane.b32.xlu0 %v649_v10, %s1467_s8 }
 0x875   : > { %v630_v6 = vpop.permute.xlu0 %629 }
 0x876   : > { %v632_v7 = vmul.f32 %v630_v6, %v626_v5 }
 0x878   : > { %634 = vrot.lane.b32.xlu1 %v632_v7, %s1467_s8 }
 0x879   : > { %v656_v17 = vpop.permute.xlu0 %655 }
 0x87a   : > { %1202 = vmatmul.mubr.msk.bf16.vlgmr.msra.gmra.mrb[0].mxu1 %vm302_vm7, %v656_v17 }
 0x8ea   : > { %v635_v9 = vpop.permute.xlu1 %634 }
 0x8eb   : > { %v1754_v13 = vadd.f32 %v635_v9, %v627_v8  }
 0x8ed   : > { %1354 = vtanh.f32 %v1754_v13 }
 0x8f7   : > { %v1355_v16 = vpop.eup %1354 }
 0x8f8   : > { %640 = vrot.lane.b32.xlu1 %v1355_v16, %s1468_s1 }
 0x94d   : > { %v706_v23 = vpop.f32.mrb[0].mxu1 }
 0x94e   : > { %v1203_v24 = vpop.f32.mrb[1].mxu1 }
 0x94f   : > { %v709_v25 = vpop.f32.mrb[2].mxu1 }
 0x950   : > { %v1204_v26 = vpop.f32.mrb[3].mxu1 }
 0x96a   : > { %v641_v19 = vpop.permute.xlu1 %640 }
 0x96b   : > { %v1772_v22 = vmul.f32 %v641_v19, %v626_v5  }
 0x96d   : > { %v644_v20 = vpack.c.bf16 %v1772_v22, %v1772_v22 }
 0x96f   : > { %713 = vrot.lane.b32.xlu1 %v644_v20, %s1467_s8 }
 0x9e1   : > { %v714_v21 = vpop.permute.xlu1 %713 }
 0x9e2   : > { %1210 = vmatmul.mubr.msk.bf16.vlgmr.msra.gmra.mrb[4].mxu0 %vm302_vm7, %v714_v21 }
 0x9e3   : > { %1217 = vmatprep.mubr.msk.bf16.mxu0 (!%p1798_p9), %vm1471_vm9, %v1469_v52  ;;  %1214 = vmatpush3.bf16.msra.mxu0 (!%p1798_p9), %v1360_v49 }
 0x9e4   : > { %1215 = vmatprep.subr.bf16.mxu0 (!%p1798_p9), %v1469_v52 }
 0x9e7   : > { %1216 = vmatpush3.bf16.msra.mxu0 (!%p1798_p9), %v1361_v50 }
 0xab5   : > { %v764_v27 = vpop.f32.mrb[4].mxu0 }
 0xab6   : > { %v765_v29 = vadd.f32 %v764_v27, %v706_v23  ;;  %v1211_v30 = vpop.f32.mrb[5].mxu0 }
 0xab7   : > { %v767_v31 = vpop.f32.mrb[6].mxu0 }
 0xab8   : > { %v777_v32 = vadd.f32 %v1091_v28, %v765_v29  ;;  %v1212_v33 = vpop.f32.mrb[7].mxu0 }
 0xaba   : > { %v778_v34 = vmul.f32 0.5, %v777_v32 }
 0xabc   : > { %v779_v35 = vsel %vm1606_vm5, %v777_v32, %v778_v34 }
 0xabd   : > { %1356 = vtanh.f32 %v779_v35 }
 0xac7   : > { %v1357_v36 = vpop.eup %1356 }
 0xac8   : > { %v781_v37 = vmul.f32 0.5, %v1357_v36 }
 0xaca   : > { %v782_v38 = vadd.f32 0.5, %v781_v37 }
 0xacc   : > { %v783_v39 = vsel %vm1606_vm5, %v1357_v36, %v782_v38 }
 0xacd   : > { %786 = vrot.lane.b32.xlu0 %v783_v39, %s1468_s1  ;;  %v784_v42 = vmul.f32 %v1440_v46, %v783_v39 }
 0xb3f   : > { %v787_v40 = vpop.permute.xlu0 %786 }
 0xb40   : > { %v789_v41 = vmul.f32 %v787_v40, %v783_v39 }
 0xb42   : > { %791 = vrot.lane.b32.xlu1 %v789_v41, %s1467_s8 }
 0xbb4   : > { %v792_v43 = vpop.permute.xlu1 %791 }
 0xbb5   : > { %v794_v46 = vadd.f32 %v792_v43, %v784_v42  }
 0xbb7   : > { %1358 = vtanh.f32 %v794_v46 }
 0xbc1   : > { %v1359_v44 = vpop.eup %1358 }
 0xbc2   : > { %797 = vrot.lane.b32.xlu0 %v1359_v44, %s1468_s1  ;;  %s1470_s1 = smov (!%p1798_p9), 32  }
 0xc34   : > { %v798_v45 = vpop.permute.xlu0 %797 }
 0xc35   : > { %v800_v53 = vmul.f32 %v798_v45, %v783_v39  }
 0xc37   : > { %803 = vrot.lane.b32.xlu1 %v800_v53, %s1467_s8  ;;  %v818_v48 = vpack.c.bf16 (!%p1798_p9), %v800_v53, %v800_v53 }
 0xc39   : > { %831 = vrot.lane.b32.xlu0 (!%p1798_p9), %v818_v48, %s1470_s1 }
 0xca4   : > { %817 = sbr.rel (%p1798_p9) target bundleno = 3459 (0xd83), region = 99 }
 0xca9   : > { %v804_v47 = vpop.permute.xlu1 %803 }
 0xcaa   : > { %807 = vst.msk [vmem:[%s806_s7] sm:$0xff] %vm302_vm7, %v804_v47 }
 0xcab   : > { %v832_v51 = vpop.permute.xlu0 %831 }
 0xcac   : > { %1218 = vmatmul.mubr.msk.bf16.vlgmr.msra.gmra.mrb[0].mxu0 %vm302_vm7, %v832_v51 }
 0xd7f   : > { %v882_v55 = vpop.f32.mrb[0].mxu0 }
 0xd80   : > { %v883_v56 = vadd.f32 %v1093_v54, %v882_v55  ;;  %v1219_v57 = vpop.f32.mrb[1].mxu0 }
 0xd81   : > { %v885_v58 = vpop.f32.mrb[2].mxu0 }
 0xd82   : > { %888 = vst [vmem:[#allocation5] sm:$0xff] %v883_v56  ;;  %v1220_v59 = vpop.f32.mrb[3].mxu0 }
 0xd83 PF: > { %891 = sbr.rel (!%p1798_p9) target bundleno = 3466 (0xd8a), region = 103  ;;  %s1097_s23 = sshll.u32 (%p1798_p9), %s1794_s4, 3 }
 0xd84   : > { %s893_s24 = scalar_lea.vmem (%p1798_p9), [#allocation3], %s1097_s23 }
 0xd85   : > { %v894_v60 = vld [vmem:[%s893_s24] sm:$0xff] (%p1798_p9) }
 0xd86   : > { %895 = vst [vmem:[#allocation5] sm:$0xff] (%p1798_p9), %v894_v60 }
 0xd8a PF: > { %p539_p10 = scmp.ge.s32.totalorder %s1789_s29, 8   ;;  %s1909_s0 = smov %s1789_s29 }
 0xd8b   :  { %v1362_v61 = vld [vmem:[%s1886_s15] sm:$0xff] (%p539_p10)   ;;  %v1363_v62 = vld [vmem:[%s1886_s15 + $0x8] sm:$0xff] (%p539_p10)   ;;  %v896_v63 = vld [vmem:[#allocation4] sm:$0xff] (%p539_p10) }
 0xd8c   :  { %541 = sbr.rel (!%p539_p10) target bundleno = 1698 (0x6a2), region = 136  ;;  %1221 = vmatprep.subr.bf16.mxu0 (%p539_p10), %v1362_v61  ;;  %1233 = vmatprep.subr.bf16.mxu1 (%p539_p10), %v1362_v61  ;;  %v897_v0 = vld [vmem:[#allocation4 + $0x8] sm:$0xff] (%p539_p10)  ;;  %v900_v1 = vld [vmem:[#allocation4 + $0x20] sm:$0xff] (%p539_p10)  ;;  %v898_v3 = vld [vmem:[#allocation4 + $0x10] sm:$0xff] (%p539_p10) }
 0xd8d   :  { %1222 = vmatpush3.bf16.msra.mxu0 (%p539_p10), %v1362_v61  ;;  %1235 = vmatpush3.bf16.msra.mxu1 (%p539_p10), %v1362_v61  ;;  %v904_v2 = vpack.c.bf16 (%p539_p10), %v897_v0, %v896_v63  ;;  %v901_v22 = vld [vmem:[#allocation4 + $0x28] sm:$0xff] (%p539_p10)  ;;  %v899_v4 = vld [vmem:[#allocation4 + $0x18] sm:$0xff] (%p539_p10)  ;;  %v902_v13 = vld [vmem:[#allocation4 + $0x30] sm:$0xff] (%p539_p10) }
 0xd8e   :  { %1223 = vmatprep.subr.bf16.mxu0 (%p539_p10), %v1363_v62  ;;  %1234 = vmatprep.subr.bf16.mxu1 (%p539_p10), %v1363_v62  ;;  %v906_v18 = vpack.c.bf16 (%p539_p10), %v901_v22, %v900_v1  ;;  %v903_v46 = vld [vmem:[#allocation4 + $0x38] sm:$0xff] (%p539_p10)  ;;  %v905_v53 = vpack.c.bf16 (%p539_p10), %v899_v4, %v898_v3  ;;  %v1098_v6 = vld [vmem:[%s1887_s16] ss:$0 sm:$0xff] (%p539_p10) }
 0xd8f   :  { %1225 = vmatprep.mubr.msk.bf16.mxu0 (%p539_p10), %vm302_vm7, %v904_v2  ;;  %v907_v5 = vpack.c.bf16 (%p539_p10), %v903_v46, %v902_v13 }
 0xd90   :  { %1229 = vmatprep.mubr.msk.bf16.mxu1 (%p539_p10), %vm302_vm7, %v906_v18 }
 0xd91   :  { %1224 = vmatpush3.bf16.msra.mxu0 (%p539_p10), %v1363_v62  ;;  %1236 = vmatpush3.bf16.msra.mxu1 (%p539_p10), %v1363_v62 }
 0xd94   :  { %1226 = vmatmul.mubr.msk.bf16.vlgmr.msra.gmra.mrb[0].mxu0 %vm302_vm7, %v905_v53  ;;  %1230 = vmatmul.mubr.msk.bf16.vlgmr.msra.gmra.mrb[0].mxu1 %vm302_vm7, %v907_v5 }
 0xe67   :  { %v1227_v7 = vpop.f32.mrb[0].mxu0  ;;  %v1231_v8 = vpop.f32.mrb[0].mxu1 }
 0xe68   :  { %v987_v9 = vadd.f32 %v1227_v7, %v1098_v6  ;;  %v1003_v10 = vadd.f32 %v1231_v8, %v1098_v6  ;;  %v978_v11 = vpop.f32.mrb[1].mxu0  ;;  %v994_v12 = vpop.f32.mrb[1].mxu1 }
 0xe69   :  { %v979_v14 = vadd.f32 %v1098_v6, %v978_v11  ;;  %v995_v15 = vadd.f32 %v1098_v6, %v994_v12  ;;  %v1228_v16 = vpop.f32.mrb[2].mxu0  ;;  %v1232_v17 = vpop.f32.mrb[2].mxu1 }
 0xe6a   :  { %1011 = vst [vmem:[%s1890_s19 + $0x10] sm:$0xff] %v987_v9  ;;  %1015 = vst [vmem:[%s1890_s19 + $0x30] sm:$0xff] %v1003_v10  ;;  %v990_v19 = vadd.f32 %v1228_v16, %v1098_v6  ;;  %v1006_v20 = vadd.f32 %v1232_v17, %v1098_v6  ;;  %v981_v21 = vpop.f32.mrb[3].mxu0  ;;  %v997_v23 = vpop.f32.mrb[3].mxu1 }
 0xe6b   :  { %1009 = vst [vmem:[%s1890_s19] sm:$0xff] %v979_v14  ;;  %1013 = vst [vmem:[%s1890_s19 + $0x20] sm:$0xff] %v995_v15  ;;  %v982_v24 = vadd.f32 %v1098_v6, %v981_v21  ;;  %v998_v25 = vadd.f32 %v1098_v6, %v997_v23 }
 0xe6c   :  { %1012 = vst [vmem:[%s1890_s19 + $0x18] sm:$0xff] %v990_v19  ;;  %1016 = vst [vmem:[%s1890_s19 + $0x38] sm:$0xff] %v1006_v20 }
 0xe6d   :  { %1010 = vst [vmem:[%s1890_s19 + $0x8] sm:$0xff] %v982_v24  ;;  %1014 = vst [vmem:[%s1890_s19 + $0x28] sm:$0xff] %v998_v25 }
 0xe6e   :  { %1021 = vsyncpa [#allocation7], 1 }

</bundles_post_ra>
